<compile_context>
chip_gen: v6e
topology: v6e:2x2x1
jax: 0.10.0
libtpu: 0.0.40
codegen_flags: <defaults>
</compile_context>

<pallas_src>
import math
import functools

import jax
import jax.numpy as jnp
from jax.experimental import pallas as pl
from jax.experimental.pallas import tpu as pltpu


_GELU_C = math.sqrt(2.0 / math.pi)


def _ffn_kernel(x_ref, w1_ref, b1_ref, w2_ref, b2_ref, o_ref):
    # One row tile of the FFN: [tm, d_model_p] -> [tm, d_model_p].
    x = x_ref[...]                          # operand dtype (f32 or bf16)

    # h = x @ W1t + b1   (W1t already [d_model_p, d_ff_p] in x.dtype; f32 acc)
    h = jnp.dot(x, w1_ref[...], preferred_element_type=jnp.float32)
    h = h + b1_ref[...]                     # bias stays f32

    # tanh-approx GELU (exactly the PyTorch GELU class), computed in f32.
    g = 0.5 * h * (1.0 + jnp.tanh(_GELU_C * (h + 0.044715 * h * h * h)))

    # dropout: eval-mode identity (p=0.1 at train time)
    # TODO(synk): train-mode dropout not implemented
    g = g.astype(x.dtype)                   # back to operand dtype for the MXU

    # y = g @ W2t + b2   (W2t already [d_ff_p, d_model_p] in x.dtype)
    y = jnp.dot(g, w2_ref[...], preferred_element_type=jnp.float32)
    y = y + b2_ref[...]

    o_ref[...] = y.astype(o_ref.dtype)


def _round_up(v, m):
    return (v + m - 1) // m * m


def _choose_tm(M, tm, act_itemsize):
    """Pick an MXU-friendly row tile; for small M ensure >= 2 grid blocks."""
    sub = 16 if act_itemsize < 4 else 8     # bf16 sublane packing is (16,128)
    tm = max(int(tm), sub)
    tm = _round_up(tm, 256) if tm >= 256 else _round_up(tm, sub)
    if M > tm:
        return tm
    # Small-M path: target two balanced blocks (keeps v7x's 2nd TC busy),
    # never dropping below the sublane packing tile.
    half = _round_up(pl.cdiv(M, 2), sub)
    return max(sub, min(tm, half))


def _device_vmem_cap_bytes():
    try:
        cap = int(pltpu.get_tpu_info().vmem_capacity_bytes)
    except Exception:
        cap = 128 << 20                     # v5e/v6e default
    return (cap * 7) // 8                   # leave headroom (<= ~56 MiB on v7x)


@functools.partial(jax.jit, static_argnames=("tm",))
def positionwise_ffn(x, w1, b1, w2, b2, *, tm=512):
    """x: [B, S, d_model]; w1: [d_ff, d_model]; b1: [d_ff];
    w2: [d_model, d_ff]; b2: [d_model]  (PyTorch nn.Linear conventions)."""
    B, S, d_model = x.shape
    d_ff = w1.shape[0]
    M = B * S

    # Lane-dense feature axes: pad both to multiples of 128 (no-op for
    # standard BERT dims).  Padded d_ff columns see b1 = 0 so GELU(0) = 0 and
    # the matching zero rows of W2t contribute nothing downstream.
    d_model_p = _round_up(d_model, 128)
    d_ff_p = _round_up(d_ff, 128)

    act_dtype = x.dtype
    tm_eff = _choose_tm(M, tm, act_dtype.itemsize)
    grid = pl.cdiv(M, tm_eff)               # partial last block masked by pipeline

    x2d = x.reshape(M, d_model)
    if d_model_p != d_model:
        x2d = jnp.pad(x2d, ((0, 0), (0, d_model_p - d_model)))

    # One-time wrapper-side transpose to plain [K, N] layouts + cast to the
    # activation dtype so bf16 callers hit the bf16 MXU path.
    if (d_ff_p, d_model_p) != (d_ff, d_model):
        w1 = jnp.pad(w1, ((0, d_ff_p - d_ff), (0, d_model_p - d_model)))
        w2 = jnp.pad(w2, ((0, d_model_p - d_model), (0, d_ff_p - d_ff)))
        b1 = jnp.pad(b1, (0, d_ff_p - d_ff))
        b2 = jnp.pad(b2, (0, d_model_p - d_model))
    w1t = w1.T.astype(act_dtype)            # [d_model_p, d_ff_p]
    w2t = w2.T.astype(act_dtype)            # [d_ff_p, d_model_p]
    b1_2d = b1.reshape(1, d_ff_p).astype(jnp.float32)
    b2_2d = b2.reshape(1, d_model_p).astype(jnp.float32)

    # VMEM budget matching the actual buffering:
    #   weights single-buffered, x/out tiles double-buffered, f32 h + y
    #   intermediates plus the g cast buffer, + slack.
    act_bytes = act_dtype.itemsize
    w_resident = 2 * d_model_p * d_ff_p * act_bytes
    bias_resident = (d_ff_p + d_model_p) * 4
    io_tiles = 2 * 2 * tm_eff * d_model_p * act_bytes
    inter = tm_eff * d_ff_p * (4 + act_bytes) + tm_eff * d_model_p * 4
    vmem_limit = int(w_resident + bias_resident + io_tiles + inter + (8 << 20))
    vmem_limit = min(max(vmem_limit, 32 << 20), _device_vmem_cap_bytes())

    out2d = pl.pallas_call(
        _ffn_kernel,
        out_shape=jax.ShapeDtypeStruct((M, d_model_p), act_dtype),
        grid_spec=pltpu.PrefetchScalarGridSpec(
            num_scalar_prefetch=0,
            grid=(grid,),
            in_specs=[
                pl.BlockSpec((tm_eff, d_model_p), lambda i: (i, 0)),   # x rows
                pl.BlockSpec((d_model_p, d_ff_p), lambda i: (0, 0),
                             pipeline_mode=pl.Buffered(1)),            # W1^T resident
                pl.BlockSpec((1, d_ff_p), lambda i: (0, 0),
                             pipeline_mode=pl.Buffered(1)),            # b1
                pl.BlockSpec((d_ff_p, d_model_p), lambda i: (0, 0),
                             pipeline_mode=pl.Buffered(1)),            # W2^T resident
                pl.BlockSpec((1, d_model_p), lambda i: (0, 0),
                             pipeline_mode=pl.Buffered(1)),            # b2
            ],
            out_specs=pl.BlockSpec((tm_eff, d_model_p), lambda i: (i, 0)),
        ),
        compiler_params=pltpu.CompilerParams(
            dimension_semantics=("parallel",),
            vmem_limit_bytes=vmem_limit),
    )(x2d, w1t, b1_2d, w2t, b2_2d)

    if d_model_p != d_model:
        out2d = out2d[:, :d_model]
    return out2d.reshape(B, S, d_model)


def _reference_ffn(x, w1, b1, w2, b2):
    h = jnp.einsum("bsd,fd->bsf", x, w1) + b1
    g = 0.5 * h * (1.0 + jnp.tanh(_GELU_C * (h + 0.044715 * h ** 3)))
    return jnp.einsum("bsf,df->bsd", g, w2) + b2


if __name__ == "__main__":
    # Small shapes consistent with the module: batch=2, seq=8, d_model=32, d_ff=64
    B, S, d_model, d_ff = 2, 8, 32, 64

    key = jax.random.PRNGKey(0)
    kx, k1, kb1, k2, kb2 = jax.random.split(key, 5)

    x = jax.random.normal(kx, (B, S, d_model), dtype=jnp.float32)

    # Deterministic parameter init (PyTorch nn.Linear-like uniform fan-in bounds)
    lim1 = 1.0 / math.sqrt(d_model)
    lim2 = 1.0 / math.sqrt(d_ff)
    w1 = jax.random.uniform(k1, (d_ff, d_model), jnp.float32, -lim1, lim1)
    b1 = jax.random.uniform(kb1, (d_ff,), jnp.float32, -lim1, lim1)
    w2 = jax.random.uniform(k2, (d_model, d_ff), jnp.float32, -lim2, lim2)
    b2 = jax.random.uniform(kb2, (d_model,), jnp.float32, -lim2, lim2)

    out = positionwise_ffn(x, w1, b1, w2, b2)
    out = jax.block_until_ready(out)

    ref = _reference_ffn(x, w1, b1, w2, b2)
    assert out.shape == (B, S, d_model)
    assert jnp.allclose(out, ref, atol=1e-5, rtol=1e-5), "mismatch vs reference"

    print("KERNEL_OK")
</pallas_src>

<mosaic_0001>
module attributes {stable_mosaic.version = 11 : i64} {
  func.func @_ffn_kernel(%arg0: i32, %arg1: memref<8x128xf32, #tpu.memory_space<vmem>>, %arg2: memref<128x128xf32, #tpu.memory_space<vmem>>, %arg3: memref<1x128xf32, #tpu.memory_space<vmem>>, %arg4: memref<128x128xf32, #tpu.memory_space<vmem>>, %arg5: memref<1x128xf32, #tpu.memory_space<vmem>>, %arg6: memref<8x128xf32, #tpu.memory_space<vmem>>) attributes {dimension_semantics = [#tpu.dimension_semantics<parallel>], iteration_bounds = array<i64: 2>, scalar_prefetch = 0 : i64, scratch_operands = 0 : i64, tpu.core_type = #tpu.core_type<tc>, window_params = [{transform_indices = @transform_0, window_bounds = array<i64: 8, 128>}, {pipeline_mode = #tpu.pipeline_mode<synchronous>, transform_indices = @transform_1, window_bounds = array<i64: 128, 128>}, {pipeline_mode = #tpu.pipeline_mode<synchronous>, transform_indices = @transform_2, window_bounds = array<i64: 1, 128>}, {pipeline_mode = #tpu.pipeline_mode<synchronous>, transform_indices = @transform_3, window_bounds = array<i64: 128, 128>}, {pipeline_mode = #tpu.pipeline_mode<synchronous>, transform_indices = @transform_4, window_bounds = array<i64: 1, 128>}, {transform_indices = @transform_5, window_bounds = array<i64: 8, 128>}]} {
    %c0 = arith.constant 0 : index
    %c0_0 = arith.constant 0 : index
    %0 = vector.load %arg1[%c0, %c0_0] : memref<8x128xf32, #tpu.memory_space<vmem>>, vector<8x128xf32>
    %c0_1 = arith.constant 0 : index
    %c0_2 = arith.constant 0 : index
    %1 = vector.load %arg2[%c0_1, %c0_2] : memref<128x128xf32, #tpu.memory_space<vmem>>, vector<128x128xf32>
    %cst = arith.constant dense<0.000000e+00> : vector<8x128xf32>
    %2 = tpu.matmul %0, %1, %cst {dimension_numbers = #tpu.dot_dimension_numbers<[1], [0], [0], [1], [0, 0, 1, 1], [], []>} : vector<8x128xf32>, vector<128x128xf32>, vector<8x128xf32> -> vector<8x128xf32>
    %c0_3 = arith.constant 0 : index
    %c0_4 = arith.constant 0 : index
    %3 = vector.load %arg3[%c0_3, %c0_4] : memref<1x128xf32, #tpu.memory_space<vmem>>, vector<1x128xf32>
    %4 = vector.broadcast %3 : vector<1x128xf32> to vector<8x128xf32>
    %5 = arith.addf %2, %4 : vector<8x128xf32>
    %cst_5 = arith.constant 5.000000e-01 : f32
    %6 = vector.broadcast %cst_5 : f32 to vector<8x128xf32>
    %7 = arith.mulf %6, %5 : vector<8x128xf32>
    %cst_6 = arith.constant 4.471500e-02 : f32
    %8 = vector.broadcast %cst_6 : f32 to vector<8x128xf32>
    %9 = arith.mulf %8, %5 : vector<8x128xf32>
    %10 = arith.mulf %9, %5 : vector<8x128xf32>
    %11 = arith.mulf %10, %5 : vector<8x128xf32>
    %12 = arith.addf %5, %11 : vector<8x128xf32>
    %cst_7 = arith.constant 0.797884583 : f32
    %13 = vector.broadcast %cst_7 : f32 to vector<8x128xf32>
    %14 = arith.mulf %13, %12 : vector<8x128xf32>
    %15 = math.tanh %14 : vector<8x128xf32>
    %cst_8 = arith.constant 1.000000e+00 : f32
    %16 = vector.broadcast %cst_8 : f32 to vector<8x128xf32>
    %17 = arith.addf %16, %15 : vector<8x128xf32>
    %18 = arith.mulf %7, %17 : vector<8x128xf32>
    %c0_9 = arith.constant 0 : index
    %c0_10 = arith.constant 0 : index
    %19 = vector.load %arg4[%c0_9, %c0_10] : memref<128x128xf32, #tpu.memory_space<vmem>>, vector<128x128xf32>
    %cst_11 = arith.constant dense<0.000000e+00> : vector<8x128xf32>
    %20 = tpu.matmul %18, %19, %cst_11 {dimension_numbers = #tpu.dot_dimension_numbers<[1], [0], [0], [1], [0, 0, 1, 1], [], []>} : vector<8x128xf32>, vector<128x128xf32>, vector<8x128xf32> -> vector<8x128xf32>
    %c0_12 = arith.constant 0 : index
    %c0_13 = arith.constant 0 : index
    %21 = vector.load %arg5[%c0_12, %c0_13] : memref<1x128xf32, #tpu.memory_space<vmem>>, vector<1x128xf32>
    %22 = vector.broadcast %21 : vector<1x128xf32> to vector<8x128xf32>
    %23 = arith.addf %20, %22 : vector<8x128xf32>
    %c0_14 = arith.constant 0 : index
    %c0_15 = arith.constant 0 : index
    %24 = vector.load %arg6[%c0_14, %c0_15] : memref<8x128xf32, #tpu.memory_space<vmem>>, vector<8x128xf32>
    tpu.vector_store %arg6[%c0_14, %c0_15], %23 {strides = array<i32>} : memref<8x128xf32, #tpu.memory_space<vmem>>, vector<8x128xf32>,
    return
  }
  func.func @transform_0(%arg0: i32) -> (i32, i32) {
    %c0_i32 = arith.constant 0 : i32
    %c0_i32_0 = arith.constant 0 : i32
    return %arg0, %c0_i32 : i32, i32
  }
  func.func @transform_1(%arg0: i32) -> (i32, i32) {
    %c0_i32 = arith.constant 0 : i32
    %c0_i32_0 = arith.constant 0 : i32
    %c0_i32_1 = arith.constant 0 : i32
    return %c0_i32, %c0_i32_0 : i32, i32
  }
  func.func @transform_2(%arg0: i32) -> (i32, i32) {
    %c0_i32 = arith.constant 0 : i32
    %c0_i32_0 = arith.constant 0 : i32
    %c0_i32_1 = arith.constant 0 : i32
    return %c0_i32, %c0_i32_0 : i32, i32
  }
  func.func @transform_3(%arg0: i32) -> (i32, i32) {
    %c0_i32 = arith.constant 0 : i32
    %c0_i32_0 = arith.constant 0 : i32
    %c0_i32_1 = arith.constant 0 : i32
    return %c0_i32, %c0_i32_0 : i32, i32
  }
  func.func @transform_4(%arg0: i32) -> (i32, i32) {
    %c0_i32 = arith.constant 0 : i32
    %c0_i32_0 = arith.constant 0 : i32
    %c0_i32_1 = arith.constant 0 : i32
    return %c0_i32, %c0_i32_0 : i32, i32
  }
  func.func @transform_5(%arg0: i32) -> (i32, i32) {
    %c0_i32 = arith.constant 0 : i32
    %c0_i32_0 = arith.constant 0 : i32
    return %arg0, %c0_i32 : i32, i32
  }
}

</mosaic_0001>

<bundles_post_ra>
// kernel: positionwise_ffn.1
= control target key start
LH: loop header
LB: loop body
LE: loop exit
PB: predicated region body
PF: predicated region fallthrough
CT: control target
= control target key end

     0   :  { %s637_s18 = smov 0   ;;  %s801_s0 = inlined_call_operand.vmem [shape: f32[16,128], index: 0, kind: input, shape index: {}]   ;;  %s802_s1 = inlined_call_operand.vmem [shape: f32[128,128], index: 1, kind: input, shape index: {}]   ;;  %s803_s2 = inlined_call_operand.vmem [shape: f32[1,128], index: 2, kind: input, shape index: {}]   ;;  %s804_s3 = inlined_call_operand.vmem [shape: f32[128,128], index: 3, kind: input, shape index: {}]   ;;  %s805_s4 = inlined_call_operand.vmem [shape: f32[1,128], index: 4, kind: input, shape index: {}]   ;;  %s806_s5 = inlined_call_operand.vmem [shape: f32[16,128], index: 5, kind: output, shape index: {}]  }
   0x1 LB: > { %s470_s19 = sadd.s32 4294967295, %s603_s18   ;;  %p474_p0 = scmp.ge.s32.totalorder %s603_s18, 1  ;;  %s603_s18 = sphi %s637_s18, %s15_s18  }
   0x2   : > { %p186_p1 = scmp.lt.s32.totalorder %s603_s18, 3 }
   0x4   : > { %p187_p2 = pnand %p474_p0, %p186_p1 }
   0x5   : > { %p212_p3 = scmp.lt.s32.totalorder (!%p187_p2), %s470_s19, 1 }
   0x6   : > { %190 = sbr.rel (%p187_p2) target bundleno = 463 (0x1cf), region = 40 }
   0xb   : > { %v236_v0 = vld [vmem:[%s802_s1 + $0x78] sm:$0xff]  ;;  %v605_v1 = vmov 0.0   ;;  %v235_v2 = vld [vmem:[%s802_s1 + $0x70] sm:$0xff]  ;;  %vm606_vm0 = vmmov 0   ;;  %v234_v3 = vld [vmem:[%s802_s1 + $0x68] sm:$0xff]  ;;  %s808_s19 = smov (!%p212_p3, %s470_s19), 1 }
   0xc   : > { %515 = vmatprep.subr.mxu0 %v605_v1  ;;  %547 = vmatprep.mubr.msk.f32.mxu0 %vm606_vm0, %v605_v1  ;;  %v233_v4 = vld [vmem:[%s802_s1 + $0x60] sm:$0xff]  ;;  %v232_v5 = vld [vmem:[%s802_s1 + $0x58] sm:$0xff]  ;;  %v231_v6 = vld [vmem:[%s802_s1 + $0x50] sm:$0xff]  ;;  %s475_s23 = sshll.u32 %s808_s19, 3 }
   0xd   : > { %516 = vmatpush3.msra.mxu0 %v236_v0  ;;  %550 = vmatprep.subr.mxu1 %v605_v1  ;;  %v230_v7 = vld [vmem:[%s802_s1 + $0x48] sm:$0xff]  ;;  %v229_v8 = vld [vmem:[%s802_s1 + $0x40] sm:$0xff]  ;;  %v228_v9 = vld [vmem:[%s802_s1 + $0x38] sm:$0xff]  ;;  %s215_s30 = scalar_lea.vmem %s801_s0, %s475_s23  ;;  %s219_s27 = scalar_lea.vmem %s806_s5, %s475_s23 }
   0xe   : > { %517 = vmatprep.subr.mxu0 %v605_v1  ;;  %582 = vmatprep.mubr.msk.f32.mxu1 %vm606_vm0, %v605_v1  ;;  %v227_v10 = vld [vmem:[%s802_s1 + $0x30] sm:$0xff]  ;;  %v226_v11 = vld [vmem:[%s802_s1 + $0x28] sm:$0xff]  ;;  %v225_v12 = vld [vmem:[%s802_s1 + $0x20] sm:$0xff] }
   0xf   : > { %518 = vmatpush3.msra.mxu0 %v235_v2  ;;  %v224_v13 = vld [vmem:[%s802_s1 + $0x18] sm:$0xff]  ;;  %v223_v14 = vld [vmem:[%s802_s1 + $0x10] sm:$0xff]  ;;  %v222_v15 = vld [vmem:[%s802_s1 + $0x8] sm:$0xff] }
  0x10   : > { %519 = vmatprep.subr.mxu0 %v605_v1  ;;  %v221_v16 = vld [vmem:[%s802_s1] sm:$0xff]  ;;  %v338_v18 = vld [vmem:[%s804_s3 + $0x78] sm:$0xff]  ;;  %v337_v19 = vld [vmem:[%s804_s3 + $0x70] sm:$0xff] }
  0x11   : > { %520 = vmatpush3.msra.mxu0 %v234_v3  ;;  %v220_v17 = vld [vmem:[%s215_s30] sm:$0xff]  ;;  %551 = vmatpush3.msra.mxu1 %v338_v18  ;;  %v336_v20 = vld [vmem:[%s804_s3 + $0x68] sm:$0xff]  ;;  %v334_v22 = vld [vmem:[%s804_s3 + $0x58] sm:$0xff] }
  0x12   : > { %521 = vmatprep.subr.mxu0 %v605_v1  ;;  %552 = vmatprep.subr.mxu1 %v605_v1  ;;  %v335_v21 = vld [vmem:[%s804_s3 + $0x60] sm:$0xff]  ;;  %v333_v23 = vld [vmem:[%s804_s3 + $0x50] sm:$0xff]  ;;  %v332_v24 = vld [vmem:[%s804_s3 + $0x48] sm:$0xff] }
  0x13   : > { %522 = vmatpush3.msra.mxu0 %v233_v4  ;;  %553 = vmatpush3.msra.mxu1 %v337_v19  ;;  %v331_v25 = vld [vmem:[%s804_s3 + $0x40] sm:$0xff]  ;;  %v330_v26 = vld [vmem:[%s804_s3 + $0x38] sm:$0xff]  ;;  %v329_v27 = vld [vmem:[%s804_s3 + $0x30] sm:$0xff] }
  0x14   : > { %523 = vmatprep.subr.mxu0 %v605_v1  ;;  %554 = vmatprep.subr.mxu1 %v605_v1  ;;  %v328_v28 = vld [vmem:[%s804_s3 + $0x28] sm:$0xff]  ;;  %v327_v29 = vld [vmem:[%s804_s3 + $0x20] sm:$0xff]  ;;  %v326_v30 = vld [vmem:[%s804_s3 + $0x18] sm:$0xff] }
  0x15   : > { %524 = vmatpush3.msra.mxu0 %v232_v5  ;;  %555 = vmatpush3.msra.mxu1 %v336_v20  ;;  %v325_v31 = vld [vmem:[%s804_s3 + $0x10] sm:$0xff]  ;;  %v324_v32 = vld [vmem:[%s804_s3 + $0x8] sm:$0xff]  ;;  %v323_v33 = vld [vmem:[%s804_s3] sm:$0xff] }
  0x16   : > { %525 = vmatprep.subr.mxu0 %v605_v1  ;;  %556 = vmatprep.subr.mxu1 %v605_v1  ;;  %v477_v34 = vld [vmem:[%s803_s2] ss:$0 sm:$0xff] }
  0x17   : > { %526 = vmatpush3.msra.mxu0 %v231_v6  ;;  %557 = vmatpush3.msra.mxu1 %v335_v21  ;;  %v478_v47 = vld [vmem:[%s805_s4] ss:$0 sm:$0xff] }
  0x18   : > { %527 = vmatprep.subr.mxu0 %v605_v1  ;;  %558 = vmatprep.subr.mxu1 %v605_v1 }
  0x19   : > { %528 = vmatpush3.msra.mxu0 %v230_v7  ;;  %559 = vmatpush3.msra.mxu1 %v334_v22 }
  0x1a   : > { %529 = vmatprep.subr.mxu0 %v605_v1  ;;  %560 = vmatprep.subr.mxu1 %v605_v1 }
  0x1b   : > { %530 = vmatpush3.msra.mxu0 %v229_v8  ;;  %561 = vmatpush3.msra.mxu1 %v333_v23 }
  0x1c   : > { %531 = vmatprep.subr.mxu0 %v605_v1  ;;  %562 = vmatprep.subr.mxu1 %v605_v1 }
  0x1d   : > { %532 = vmatpush3.msra.mxu0 %v228_v9  ;;  %563 = vmatpush3.msra.mxu1 %v332_v24 }
  0x1e   : > { %533 = vmatprep.subr.mxu0 %v605_v1  ;;  %564 = vmatprep.subr.mxu1 %v605_v1 }
  0x1f   : > { %534 = vmatpush3.msra.mxu0 %v227_v10  ;;  %565 = vmatpush3.msra.mxu1 %v331_v25 }
  0x20   : > { %535 = vmatprep.subr.mxu0 %v605_v1  ;;  %566 = vmatprep.subr.mxu1 %v605_v1 }
  0x21   : > { %536 = vmatpush3.msra.mxu0 %v226_v11  ;;  %567 = vmatpush3.msra.mxu1 %v330_v26 }
  0x22   : > { %537 = vmatprep.subr.mxu0 %v605_v1  ;;  %568 = vmatprep.subr.mxu1 %v605_v1 }
  0x23   : > { %538 = vmatpush3.msra.mxu0 %v225_v12  ;;  %569 = vmatpush3.msra.mxu1 %v329_v27 }
  0x24   : > { %539 = vmatprep.subr.mxu0 %v605_v1  ;;  %570 = vmatprep.subr.mxu1 %v605_v1 }
  0x25   : > { %540 = vmatpush3.msra.mxu0 %v224_v13  ;;  %571 = vmatpush3.msra.mxu1 %v328_v28 }
  0x26   : > { %541 = vmatprep.subr.mxu0 %v605_v1  ;;  %572 = vmatprep.subr.mxu1 %v605_v1 }
  0x27   : > { %542 = vmatpush3.msra.mxu0 %v223_v14  ;;  %573 = vmatpush3.msra.mxu1 %v327_v29 }
  0x28   : > { %543 = vmatprep.subr.mxu0 %v605_v1  ;;  %574 = vmatprep.subr.mxu1 %v605_v1 }
  0x29   : > { %544 = vmatpush3.msra.mxu0 %v222_v15  ;;  %575 = vmatpush3.msra.mxu1 %v326_v30 }
  0x2a   : > { %545 = vmatprep.subr.mxu0 %v605_v1  ;;  %576 = vmatprep.subr.mxu1 %v605_v1 }
  0x2b   : > { %546 = vmatpush3.msra.mxu0 %v221_v16  ;;  %577 = vmatpush3.msra.mxu1 %v325_v31 }
  0x2c   : > { %548 = vmatmul.mubr.f32.vlgmr.msra.gmra.mxu0 %v220_v17  ;;  %578 = vmatprep.subr.mxu1 %v605_v1 }
  0x2d   : > { %579 = vmatpush3.msra.mxu1 %v324_v32 }
  0x2e   : > { %580 = vmatprep.subr.mxu1 %v605_v1 }
  0x2f   : > { %581 = vmatpush3.msra.mxu1 %v323_v33 }
  0xec   : > { %v310_v35 = vpop.f32.mrf.mxu0 }
  0xed   : > { %v311_v36 = vadd.f32 %v477_v34, %v310_v35 }
  0xee   : > { %v549_v37 = vpop.f32.mrf.mxu0 }
  0xef   : > { %v315_v38 = vmul.f32 0.044715, %v311_v36  ;;  %v314_v44 = vmul.f32 0.5, %v311_v36 }
  0xf1   : > { %v316_v39 = vmul.f32 %v315_v38, %v311_v36 }
  0xf3   : > { %v317_v40 = vmul.f32 %v316_v39, %v311_v36 }
  0xf5   : > { %v318_v41 = vadd.f32 %v317_v40, %v311_v36 }
  0xf7   : > { %v319_v42 = vmul.f32 0.7978846, %v318_v41 }
  0xf9   : > { %595 = vtanh.f32 %v319_v42 }
 0x106   : > { %v596_v43 = vpop.eup %595 }
 0x107   : > { %v321_v45 = vadd.f32 1.0, %v596_v43 }
 0x109   : > { %v322_v46 = vmul.f32 %v321_v45, %v314_v44 }
 0x10b   : > { %583 = vmatmul.mubr.f32.vlgmr.msra.gmra.mxu1 %v322_v46 }
 0x1cb   : > { %v412_v48 = vpop.f32.mrf.mxu1 }
 0x1cc   : > { %v413_v49 = vadd.f32 %v478_v47, %v412_v48 }
 0x1cd   : > { %v584_v50 = vpop.f32.mrf.mxu1 }
 0x1ce   : > { %416 = vst [vmem:[%s219_s27] sm:$0xff] %v413_v49 }
 0x1cf PF: > { %s15_s18 = sadd.s32 1, %s603_s18  }
 0x1d0   : > { %p12_p4 = scmp.ge.s32.totalorder %s15_s18, 4  }
 0x1d2   :  { %14 = sbr.rel (!%p12_p4) target bundleno = 1 (0x1), region = 70 }

</bundles_post_ra>
